<compile_context>
chip_gen: v7x
topology: tpu7x:2x2x1
jax: 0.10.0
libtpu: 0.0.40
codegen_flags: <defaults>
</compile_context>

<pallas_src>
import functools

import jax
import jax.numpy as jnp
from jax.experimental import pallas as pl
from jax.experimental.pallas import tpu as pltpu


def _cdiv(a, b):
    return (a + b - 1) // b


def _round_up(x, m):
    return ((x + m - 1) // m) * m


def _mxu_lane_align():
    """256 for v6e/v7x (2x256x256 MXU), 128 for v5e and older (128x128)."""
    try:
        kind = jax.devices()[0].device_kind.lower()
    except Exception:
        return 128
    if any(g in kind for g in ("v2", "v3", "v4", "v5")):
        return 128
    return 256


def _pad_dim(d, align):
    # Small dims stay at 128 (minimum lane tile); large dims align to the MXU.
    if d <= 128 or align <= 128:
        return _round_up(d, 128)
    return _round_up(d, align)


# ---------------------------------------------------------------------------
# Kernel
# ---------------------------------------------------------------------------
def _actor_critic_kernel(x_ref, w1_ref, b1_ref, w2_ref, b2_ref,
                         wh_ref, bh_ref, out_ref, *, num_actions):
    """Trunk (Linear-ReLU-Linear-ReLU) + fused 3-way head in one pass.

    Head output layout (lane axis): [mean (A) | log_std->std (A) | value (1) | pad].
    """
    cd = w1_ref.dtype                      # bf16 compute, f32 MXU accumulation
    x = x_ref[...].astype(cd)              # cast in-kernel; no wrapper pad/cast

    h = jnp.dot(x, w1_ref[...], preferred_element_type=jnp.float32) + b1_ref[...]
    h = jnp.maximum(h, 0.0).astype(cd)
    h = jnp.dot(h, w2_ref[...], preferred_element_type=jnp.float32) + b2_ref[...]
    h = jnp.maximum(h, 0.0).astype(cd)

    # Single fused head matmul (mean | log_std | value), lane-dense output.
    raw = jnp.dot(h, wh_ref[...], preferred_element_type=jnp.float32) + bh_ref[...]

    # clamp(-20, 2) + exp only on the log_std columns via a column mask.
    # Kept full-tile on purpose: exp rides the EUP slot, select rides the VPU,
    # both have slack relative to the MXU/DMA path (review: don't pessimize).
    col = jax.lax.broadcasted_iota(jnp.int32, raw.shape, 1)
    is_log_std = jnp.logical_and(col >= num_actions, col < 2 * num_actions)
    std = jnp.exp(jnp.clip(raw, -20.0, 2.0))
    out_ref[...] = jnp.where(is_log_std, std, raw).astype(out_ref.dtype)


# ---------------------------------------------------------------------------
# One-time parameter preparation (hoisted out of the per-call path)
# ---------------------------------------------------------------------------
def prepare_params(params, *, compute_dtype=jnp.bfloat16):
    """Pad / concat heads / cast the weights ONCE; reuse across forward calls."""
    (w1, b1, w2, b2, wm, bm, wls, bls, wc, bc) = params
    S, H1 = w1.shape
    H2 = w2.shape[1]
    A = wm.shape[1]

    align = _mxu_lane_align()
    h1_p = _pad_dim(H1, align)
    h2_p = _pad_dim(H2, align)
    n_head = 2 * A + 1                           # mean | log_std | value
    out_p = _pad_dim(n_head, align)

    def pad2(a, r, c):
        return jnp.pad(a, ((0, r - a.shape[0]), (0, c - a.shape[1])))

    prepared = dict(
        # Layer-1 contraction dim stays at native S: padding it would force
        # padding the activations too (it buys nothing numerically; zeros are exact).
        w1=pad2(w1, S, h1_p).astype(compute_dtype),
        b1=pad2(b1, 1, h1_p).astype(jnp.float32),
        w2=pad2(w2, h1_p, h2_p).astype(compute_dtype),
        b2=pad2(b2, 1, h2_p).astype(jnp.float32),
        wh=pad2(jnp.concatenate([wm, wls, wc], axis=1), h2_p, out_p).astype(compute_dtype),
        bh=pad2(jnp.concatenate([bm, bls, bc], axis=1), 1, out_p).astype(jnp.float32),
    )
    meta = dict(S=S, A=A, h1_p=h1_p, h2_p=h2_p, out_p=out_p, n_head=n_head)
    return prepared, meta


# ---------------------------------------------------------------------------
# Forward wrapper
# ---------------------------------------------------------------------------
def _choose_batch_tile(B, batch_tile):
    if B <= 16:                       # too small to split usefully
        return _round_up(B, 8)
    # >=2 tiles whenever possible so both v7x TensorCores get work, and tb
    # chosen so that b_p - B < 8 (no full ghost tile for B just above batch_tile).
    n_tiles = max(2, _cdiv(B, batch_tile))
    return _round_up(_cdiv(B, n_tiles), 8)


def _vmem_limit_bytes(tb, S, h1_p, h2_p, out_p, compute_dtype, out_dtype):
    cs = jnp.dtype(compute_dtype).itemsize
    os_ = jnp.dtype(out_dtype).itemsize
    weights = (S * h1_p + h1_p * h2_p + h2_p * out_p) * cs      # single-buffered
    biases = (h1_p + h2_p + out_p) * 4
    x_io = 2 * tb * S * 4                                       # double-buffered input
    out_io = 2 * tb * out_p * os_                               # double-buffered output
    inter = tb * (h1_p + h2_p + out_p) * 4 + tb * (h1_p + h2_p) * cs
    total = weights + biases + x_io + out_io + inter
    return int(min(max(2 * total + (4 << 20), 16 << 20), 64 << 20))


def actor_critic_forward(state, prepared, meta, *, batch_tile=512,
                         head_out_dtype=jnp.float32):
    """Returns (mean, std, value) matching the PyTorch ActorCritic.forward."""
    B, S = state.shape
    assert S == meta["S"], "state feature dim does not match prepared params"
    A = meta["A"]
    h1_p, h2_p, out_p = meta["h1_p"], meta["h2_p"], meta["out_p"]

    tb = _choose_batch_tile(B, batch_tile)
    b_p = _round_up(B, tb)
    x = state if b_p == B else jnp.pad(state, ((0, b_p - B), (0, 0)))

    cdt = prepared["w1"].dtype

    def resident(shape):
        # Grid-invariant weights: constant index_map, single-buffered (they are
        # never re-fetched, so the second pipeline buffer is pure VMEM waste --
        # matters on v7x's 64 MiB VMEM with large hidden dims).
        return pl.BlockSpec(shape, lambda i: (0, 0), pipeline_mode=pl.Buffered(1))

    flops = 2 * b_p * (S * h1_p + h1_p * h2_p + h2_p * out_p)
    bytes_accessed = (b_p * S * state.dtype.itemsize
                      + sum(int(v.size) * v.dtype.itemsize for v in prepared.values())
                      + b_p * out_p * jnp.dtype(head_out_dtype).itemsize)
    cost = pl.CostEstimate(flops=flops, transcendentals=b_p * out_p,
                           bytes_accessed=bytes_accessed)

    kernel = functools.partial(_actor_critic_kernel, num_actions=A)
    out = pl.pallas_call(
        kernel,
        out_shape=jax.ShapeDtypeStruct((b_p, out_p), head_out_dtype),
        grid=(b_p // tb,),
        in_specs=[
            # Activations at native width: (tb, S) block, full-extent last dim
            # (exempt from the 128-lane rule); cast to bf16 inside the kernel.
            pl.BlockSpec((tb, S), lambda i: (i, 0)),
            resident((S, h1_p)), resident((1, h1_p)),        # layer 1
            resident((h1_p, h2_p)), resident((1, h2_p)),     # layer 2
            resident((h2_p, out_p)), resident((1, out_p)),   # fused heads
        ],
        out_specs=pl.BlockSpec((tb, out_p), lambda i: (i, 0)),
        compiler_params=pltpu.CompilerParams(
            dimension_semantics=("parallel",),
            vmem_limit_bytes=_vmem_limit_bytes(tb, S, h1_p, h2_p, out_p,
                                               cdt, head_out_dtype),
        ),
        cost_estimate=cost,
    )(x, prepared["w1"], prepared["b1"], prepared["w2"], prepared["b2"],
      prepared["wh"], prepared["bh"])

    out = out.astype(jnp.float32)
    mean = out[:B, :A]
    std = out[:B, A:2 * A]
    value = out[:B, 2 * A:2 * A + 1]
    return mean, std, value


# ---------------------------------------------------------------------------
# Params / reference
# ---------------------------------------------------------------------------
def init_linear(key, fan_in, fan_out):
    """PyTorch nn.Linear-style uniform(+/- 1/sqrt(fan_in)) init, (in, out) layout."""
    kw, kb = jax.random.split(key)
    bound = 1.0 / (fan_in ** 0.5)
    w = jax.random.uniform(kw, (fan_in, fan_out), jnp.float32, -bound, bound)
    b = jax.random.uniform(kb, (1, fan_out), jnp.float32, -bound, bound)
    return w, b


def make_params(key, num_states, num_actions, num_hidden_l1, num_hidden_l2):
    keys = jax.random.split(key, 5)
    w1, b1 = init_linear(keys[0], num_states, num_hidden_l1)
    w2, b2 = init_linear(keys[1], num_hidden_l1, num_hidden_l2)
    wm, bm = init_linear(keys[2], num_hidden_l2, num_actions)
    wls, bls = init_linear(keys[3], num_hidden_l2, num_actions)
    wc, bc = init_linear(keys[4], num_hidden_l2, 1)
    return (w1, b1, w2, b2, wm, bm, wls, bls, wc, bc)


def reference_forward(state, params, compute_dtype=jnp.bfloat16):
    """Pure-JAX reference with the same bf16-input / f32-accumulate policy.
    (bf16 weights/activations => matches the f32 torch model to ~2e-2.)"""
    (w1, b1, w2, b2, wm, bm, wls, bls, wc, bc) = params
    cd = compute_dtype
    x = state.astype(cd)
    h = jnp.dot(x, w1.astype(cd), preferred_element_type=jnp.float32) + b1
    h = jnp.maximum(h, 0.0).astype(cd)
    h = jnp.dot(h, w2.astype(cd), preferred_element_type=jnp.float32) + b2
    h = jnp.maximum(h, 0.0).astype(cd)
    mean = jnp.dot(h, wm.astype(cd), preferred_element_type=jnp.float32) + bm
    log_std = jnp.dot(h, wls.astype(cd), preferred_element_type=jnp.float32) + bls
    std = jnp.exp(jnp.clip(log_std, -20.0, 2.0))
    value = jnp.dot(h, wc.astype(cd), preferred_element_type=jnp.float32) + bc
    return mean, std, value


if __name__ == "__main__":
    # MountainCarContinuous-like small config
    num_states, num_actions = 2, 1
    num_hidden_l1, num_hidden_l2 = 32, 32
    batch = 8

    key = jax.random.PRNGKey(0)
    k_params, k_state = jax.random.split(key)
    params = make_params(k_params, num_states, num_actions,
                         num_hidden_l1, num_hidden_l2)
    state = jax.random.normal(k_state, (batch, num_states), jnp.float32)

    # One-time parameter preparation (pad / head concat / bf16 cast), reused
    # across every forward call.
    prepared, meta = prepare_params(params)
    prepared = jax.block_until_ready(prepared)

    fwd = jax.jit(functools.partial(actor_critic_forward,
                                    prepared=prepared, meta=meta))
    mean, std, value = jax.block_until_ready(fwd(state))

    # sanity check against pure-JAX reference (same bf16/f32 dtype policy)
    ref_mean, ref_std, ref_value = reference_forward(state, params)
    assert mean.shape == (batch, num_actions)
    assert std.shape == (batch, num_actions)
    assert value.shape == (batch, 1)
    assert jnp.allclose(mean, ref_mean, atol=2e-2, rtol=2e-2)
    assert jnp.allclose(std, ref_std, atol=2e-2, rtol=2e-2)
    assert jnp.allclose(value, ref_value, atol=2e-2, rtol=2e-2)

    print("KERNEL_OK")
</pallas_src>

<mosaic_0001>
module attributes {stable_mosaic.version = 11 : i64} {
  func.func @_actor_critic_kernel(%arg0: i32, %arg1: memref<8x2xf32, #tpu.memory_space<vmem>>, %arg2: memref<2x128xbf16, #tpu.memory_space<vmem>>, %arg3: memref<1x128xf32, #tpu.memory_space<vmem>>, %arg4: memref<128x128xbf16, #tpu.memory_space<vmem>>, %arg5: memref<1x128xf32, #tpu.memory_space<vmem>>, %arg6: memref<128x128xbf16, #tpu.memory_space<vmem>>, %arg7: memref<1x128xf32, #tpu.memory_space<vmem>>, %arg8: memref<8x128xf32, #tpu.memory_space<vmem>>) attributes {dimension_semantics = [#tpu.dimension_semantics<parallel>], iteration_bounds = array<i64: 1>, scalar_prefetch = 0 : i64, scratch_operands = 0 : i64, tpu.core_type = #tpu.core_type<tc>, window_params = [{transform_indices = @transform_0, window_bounds = array<i64: 8, 2>}, {pipeline_mode = #tpu.pipeline_mode<synchronous>, transform_indices = @transform_1, window_bounds = array<i64: 2, 128>}, {pipeline_mode = #tpu.pipeline_mode<synchronous>, transform_indices = @transform_2, window_bounds = array<i64: 1, 128>}, {pipeline_mode = #tpu.pipeline_mode<synchronous>, transform_indices = @transform_3, window_bounds = array<i64: 128, 128>}, {pipeline_mode = #tpu.pipeline_mode<synchronous>, transform_indices = @transform_4, window_bounds = array<i64: 1, 128>}, {pipeline_mode = #tpu.pipeline_mode<synchronous>, transform_indices = @transform_5, window_bounds = array<i64: 128, 128>}, {pipeline_mode = #tpu.pipeline_mode<synchronous>, transform_indices = @transform_6, window_bounds = array<i64: 1, 128>}, {transform_indices = @transform_7, window_bounds = array<i64: 8, 128>}]} {
    %c0 = arith.constant 0 : index
    %c0_0 = arith.constant 0 : index
    %0 = vector.load %arg1[%c0, %c0_0] : memref<8x2xf32, #tpu.memory_space<vmem>>, vector<8x2xf32>
    %1 = arith.truncf %0 : vector<8x2xf32> to vector<8x2xbf16>
    %c0_1 = arith.constant 0 : index
    %c0_2 = arith.constant 0 : index
    %2 = vector.load %arg2[%c0_1, %c0_2] : memref<2x128xbf16, #tpu.memory_space<vmem>>, vector<2x128xbf16>
    %cst = arith.constant dense<0.000000e+00> : vector<8x128xf32>
    %3 = tpu.matmul %1, %2, %cst {dimension_numbers = #tpu.dot_dimension_numbers<[1], [0], [0], [1], [0, 0, 1, 1], [], []>} : vector<8x2xbf16>, vector<2x128xbf16>, vector<8x128xf32> -> vector<8x128xf32>
    %c0_3 = arith.constant 0 : index
    %c0_4 = arith.constant 0 : index
    %4 = vector.load %arg3[%c0_3, %c0_4] : memref<1x128xf32, #tpu.memory_space<vmem>>, vector<1x128xf32>
    %5 = vector.broadcast %4 : vector<1x128xf32> to vector<8x128xf32>
    %6 = arith.addf %3, %5 : vector<8x128xf32>
    %cst_5 = arith.constant 0.000000e+00 : f32
    %7 = vector.broadcast %cst_5 : f32 to vector<8x128xf32>
    %8 = arith.maximumf %6, %7 : vector<8x128xf32>
    %9 = arith.truncf %8 : vector<8x128xf32> to vector<8x128xbf16>
    %c0_6 = arith.constant 0 : index
    %c0_7 = arith.constant 0 : index
    %10 = vector.load %arg4[%c0_6, %c0_7] : memref<128x128xbf16, #tpu.memory_space<vmem>>, vector<128x128xbf16>
    %cst_8 = arith.constant dense<0.000000e+00> : vector<8x128xf32>
    %11 = tpu.matmul %9, %10, %cst_8 {dimension_numbers = #tpu.dot_dimension_numbers<[1], [0], [0], [1], [0, 0, 1, 1], [], []>} : vector<8x128xbf16>, vector<128x128xbf16>, vector<8x128xf32> -> vector<8x128xf32>
    %c0_9 = arith.constant 0 : index
    %c0_10 = arith.constant 0 : index
    %12 = vector.load %arg5[%c0_9, %c0_10] : memref<1x128xf32, #tpu.memory_space<vmem>>, vector<1x128xf32>
    %13 = vector.broadcast %12 : vector<1x128xf32> to vector<8x128xf32>
    %14 = arith.addf %11, %13 : vector<8x128xf32>
    %cst_11 = arith.constant 0.000000e+00 : f32
    %15 = vector.broadcast %cst_11 : f32 to vector<8x128xf32>
    %16 = arith.maximumf %14, %15 : vector<8x128xf32>
    %17 = arith.truncf %16 : vector<8x128xf32> to vector<8x128xbf16>
    %c0_12 = arith.constant 0 : index
    %c0_13 = arith.constant 0 : index
    %18 = vector.load %arg6[%c0_12, %c0_13] : memref<128x128xbf16, #tpu.memory_space<vmem>>, vector<128x128xbf16>
    %cst_14 = arith.constant dense<0.000000e+00> : vector<8x128xf32>
    %19 = tpu.matmul %17, %18, %cst_14 {dimension_numbers = #tpu.dot_dimension_numbers<[1], [0], [0], [1], [0, 0, 1, 1], [], []>} : vector<8x128xbf16>, vector<128x128xbf16>, vector<8x128xf32> -> vector<8x128xf32>
    %c0_15 = arith.constant 0 : index
    %c0_16 = arith.constant 0 : index
    %20 = vector.load %arg7[%c0_15, %c0_16] : memref<1x128xf32, #tpu.memory_space<vmem>>, vector<1x128xf32>
    %21 = vector.broadcast %20 : vector<1x128xf32> to vector<8x128xf32>
    %22 = arith.addf %19, %21 : vector<8x128xf32>
    %23 = tpu.iota {dimensions = array<i32: 1>} : vector<8x128xi32>
    %c1_i32 = arith.constant 1 : i32
    %24 = vector.broadcast %c1_i32 : i32 to vector<8x128xi32>
    %25 = arith.cmpi sge, %23, %24 : vector<8x128xi32>
    %c2_i32 = arith.constant 2 : i32
    %26 = vector.broadcast %c2_i32 : i32 to vector<8x128xi32>
    %27 = arith.cmpi slt, %23, %26 : vector<8x128xi32>
    %28 = arith.andi %25, %27 : vector<8x128xi1>
    %cst_17 = arith.constant -2.000000e+01 : f32
    %cst_18 = arith.constant 2.000000e+00 : f32
    %29 = vector.broadcast %cst_17 : f32 to vector<8x128xf32>
    %30 = arith.maximumf %29, %22 : vector<8x128xf32>
    %31 = vector.broadcast %cst_18 : f32 to vector<8x128xf32>
    %32 = arith.minimumf %31, %30 : vector<8x128xf32>
    %33 = math.exp %32 : vector<8x128xf32>
    %34 = arith.select %28, %33, %22 : vector<8x128xi1>, vector<8x128xf32>
    %c0_19 = arith.constant 0 : index
    %c0_20 = arith.constant 0 : index
    %35 = vector.load %arg8[%c0_19, %c0_20] : memref<8x128xf32, #tpu.memory_space<vmem>>, vector<8x128xf32>
    tpu.vector_store %arg8[%c0_19, %c0_20], %34 {strides = array<i32>} : memref<8x128xf32, #tpu.memory_space<vmem>>, vector<8x128xf32>,
    return
  }
  func.func @transform_0(%arg0: i32) -> (i32, i32) {
    %c0_i32 = arith.constant 0 : i32
    %c0_i32_0 = arith.constant 0 : i32
    return %arg0, %c0_i32 : i32, i32
  }
  func.func @transform_1(%arg0: i32) -> (i32, i32) {
    %c0_i32 = arith.constant 0 : i32
    %c0_i32_0 = arith.constant 0 : i32
    %c0_i32_1 = arith.constant 0 : i32
    return %c0_i32, %c0_i32_0 : i32, i32
  }
  func.func @transform_2(%arg0: i32) -> (i32, i32) {
    %c0_i32 = arith.constant 0 : i32
    %c0_i32_0 = arith.constant 0 : i32
    %c0_i32_1 = arith.constant 0 : i32
    return %c0_i32, %c0_i32_0 : i32, i32
  }
  func.func @transform_3(%arg0: i32) -> (i32, i32) {
    %c0_i32 = arith.constant 0 : i32
    %c0_i32_0 = arith.constant 0 : i32
    %c0_i32_1 = arith.constant 0 : i32
    return %c0_i32, %c0_i32_0 : i32, i32
  }
  func.func @transform_4(%arg0: i32) -> (i32, i32) {
    %c0_i32 = arith.constant 0 : i32
    %c0_i32_0 = arith.constant 0 : i32
    %c0_i32_1 = arith.constant 0 : i32
    return %c0_i32, %c0_i32_0 : i32, i32
  }
  func.func @transform_5(%arg0: i32) -> (i32, i32) {
    %c0_i32 = arith.constant 0 : i32
    %c0_i32_0 = arith.constant 0 : i32
    %c0_i32_1 = arith.constant 0 : i32
    return %c0_i32, %c0_i32_0 : i32, i32
  }
  func.func @transform_6(%arg0: i32) -> (i32, i32) {
    %c0_i32 = arith.constant 0 : i32
    %c0_i32_0 = arith.constant 0 : i32
    %c0_i32_1 = arith.constant 0 : i32
    return %c0_i32, %c0_i32_0 : i32, i32
  }
  func.func @transform_7(%arg0: i32) -> (i32, i32) {
    %c0_i32 = arith.constant 0 : i32
    %c0_i32_0 = arith.constant 0 : i32
    return %arg0, %c0_i32 : i32, i32
  }
}

</mosaic_0001>

<bundles_post_ra>
// kernel: actor_critic_forward.1
= control target key start
LH: loop header
LB: loop body
LE: loop exit
PB: predicated region body
PF: predicated region fallthrough
CT: control target
= control target key end

     0   :  { %12 = vsyncpa [#allocation3], 0  ;;  %s625_s0 = inlined_call_operand.vmem [shape: f32[8,2], index: 0, kind: input, shape index: {}]   ;;  %s626_s1 = inlined_call_operand.vmem [shape: bf16[2,128], index: 1, kind: input, shape index: {}]   ;;  %s627_s2 = inlined_call_operand.vmem [shape: f32[1,128], index: 2, kind: input, shape index: {}]   ;;  %s628_s3 = inlined_call_operand.hbm [shape: bf16[128,128], index: 3, kind: input, shape index: {}]   ;;  %s629_s4 = inlined_call_operand.vmem [shape: f32[1,128], index: 4, kind: input, shape index: {}]   ;;  %s630_s5 = inlined_call_operand.hbm [shape: bf16[128,128], index: 5, kind: input, shape index: {}]   ;;  %s631_s6 = inlined_call_operand.vmem [shape: f32[1,128], index: 6, kind: input, shape index: {}]   ;;  %s632_s7 = inlined_call_operand.vmem [shape: f32[8,128], index: 7, kind: output, shape index: {}]  }
   0x1   :  { %13 = vsyncpa [#allocation5], 0  ;;  %s514_s24 = smov [#allocation2]   ;;  %s466_s28 = scalar_lea.hbm %s628_s3, 1024 }
   0x2   :  { %s25_s25 = sshll.u32 %s514_s24, 4  ;;  %p467_p0 = scmp.ne.s32.totalorder %s628_s3, %s466_s28  ;;  %s26_s25 = int_to_ptr.vmem [resolvable:$true] %s25_s25 }
   0x3   :  { %p470_p1 = scmp.lt.u32.totalorder %s466_s28, %s628_s3 }
   0x5   :  { %p472_p2 = pnand %p470_p1, %p467_p0 }
   0x7   :  { %475 = shalt.err (!%p472_p2)
}
   0x8   :  { %s476_s10 = scalar_lea.vmem %s26_s25, 1024  ;;  %p481_p4 = scmp.lt.s32.totalorder %s26_s25, %s26_s25 }
   0x9   :  { %p477_p3 = scmp.ne.s32.totalorder %s26_s25, %s476_s10  ;;  %p482_p5 = scmp.lt.s32.totalorder %s476_s10, %s476_s10 }
   0xb   :  { %p483_p6 = por %p482_p5, %p481_p4 }
   0xd   :  { %p484_p7 = pnand %p483_p6, %p477_p3 }
   0xf   :  { %487 = shalt.err (!%p484_p7)
}
  0x10   :  { %s515_s11 = smov 64   ;;  %s516_s12 = smov 4  }
  0x11   :  { %31 = dma.hbm_to_vmem [thread:$0]  %s628_s3, 1024, %s26_s25, [#allocation3], %s515_s11, %s515_s11, %s516_s12  }
  0x12   :  { %s517_s15 = smov [#allocation4]   ;;  %s488_s19 = scalar_lea.hbm %s630_s5, 1024 }
  0x13   :  { %s39_s16 = sshll.u32 %s517_s15, 4  ;;  %p489_p8 = scmp.ne.s32.totalorder %s630_s5, %s488_s19  ;;  %s40_s16 = int_to_ptr.vmem [resolvable:$true] %s39_s16 }
  0x14   :  { %p492_p9 = scmp.lt.u32.totalorder %s488_s19, %s630_s5 }
  0x16   :  { %p494_p10 = pnand %p492_p9, %p489_p8 }
  0x18   :  { %497 = shalt.err (!%p494_p10)
}
  0x19   :  { %s498_s24 = scalar_lea.vmem %s40_s16, 1024  ;;  %p503_p12 = scmp.lt.s32.totalorder %s40_s16, %s40_s16 }
  0x1a   :  { %p499_p11 = scmp.ne.s32.totalorder %s40_s16, %s498_s24  ;;  %p504_p13 = scmp.lt.s32.totalorder %s498_s24, %s498_s24 }
  0x1c   :  { %p505_p0 = por %p504_p13, %p503_p12 }
  0x1e   :  { %p506_p1 = pnand %p505_p0, %p499_p11 }
  0x20   :  { %509 = shalt.err (!%p506_p1)
}
  0x21   :  { %45 = dma.hbm_to_vmem [thread:$0]  %s630_s5, 1024, %s40_s16, [#allocation5], %s515_s11, %s515_s11, %s516_s12  }
  0x22   :  { %510 = dma.done.wait [#allocation3], 1024  }
  0x23   :  { %511 = vsyncadd [#allocation3], 4294966272 }
  0x24   :  { %512 = dma.done.wait [#allocation5], 1024  }
  0x25   :  { %513 = vsyncadd [#allocation5], 4294966272  ;;  %v518_v0 = vmov 0.0   ;;  %vm519_vm0 = vmmov 0   ;;  %vm69_vm1 = vcmask 1040384   ;;  %v55_v2 = vld [vmem:[%s625_s0] sm:$0xff]  ;;  %v339_v45 = vlaneseq }
  0x26   :  { %396 = vmatprep.subr.bf16.mxu0 %v518_v0  ;;  %398 = vmatprep.mubr.msk.bf16.mxu0 %vm519_vm0, %v518_v0  ;;  %v57_v1 = vld [vmem:[%s626_s1] sm:$0x1]  ;;  %v56_v4 = vpack.c.bf16 %v55_v2, %v55_v2  ;;  %vm65_vm2 = vcmask 15360   ;;  %v449_v6 = vld [vmem:[#allocation2 + $0x8] sm:$0xff]   ;;  %v450_v7 = vld [vmem:[#allocation2 + $0x10] sm:$0xff]  }
  0x27   :  { %402 = vmatprep.subr.bf16.mxu1 %v518_v0  ;;  %418 = vmatprep.mubr.msk.bf16.mxu1 %vm519_vm0, %v518_v0  ;;  %v71_v3 = vsel %vm69_vm1, %v57_v1, 0  ;;  %v448_v5 = vld [vmem:[#allocation2] sm:$0xff]   ;;  %v451_v8 = vld [vmem:[#allocation2 + $0x18] sm:$0xff]   ;;  %v453_v10 = vld [vmem:[#allocation2 + $0x28] sm:$0xff]   ;;  %v340_v47 = vand.u32 127, %v339_v45 }
  0x28   :  { %397 = vmatpush3.bf16.msra.mxu0 %v71_v3  ;;  %403 = vmatpush3.bf16.msra.mxu1 %v448_v5  ;;  %v452_v9 = vld [vmem:[#allocation2 + $0x20] sm:$0xff]   ;;  %v454_v11 = vld [vmem:[#allocation2 + $0x30] sm:$0xff]   ;;  %v455_v12 = vld [vmem:[#allocation2 + $0x38] sm:$0xff]  }
  0x29   :  { %422 = vmatprep.subr.bf16.mxu0 %v518_v0  ;;  %404 = vmatprep.subr.bf16.mxu1 %v518_v0  ;;  %v456_v13 = vld [vmem:[#allocation4] sm:$0xff]   ;;  %v457_v14 = vld [vmem:[#allocation4 + $0x8] sm:$0xff]   ;;  %v458_v15 = vld [vmem:[#allocation4 + $0x10] sm:$0xff]   ;;  %vm341_vm3 = vcmp.ge.s32.totalorder %v340_v47, 1  ;;  %vm342_vm4 = vcmp.lt.s32.totalorder %v340_v47, 2 }
  0x2a   :  { %v459_v16 = vld [vmem:[#allocation4 + $0x18] sm:$0xff]   ;;  %v460_v17 = vld [vmem:[#allocation4 + $0x20] sm:$0xff]   ;;  %v461_v18 = vld [vmem:[#allocation4 + $0x28] sm:$0xff]  }
  0x2b   :  { %399 = vmatmul.mubr.msk.bf16.vlgmr.msra.gmra.mrb[0].mxu0 %vm65_vm2, %v56_v4  ;;  %v356_v19 = vld [vmem:[%s627_s2] ss:$0 sm:$0xff]  ;;  %v462_v27 = vld [vmem:[#allocation4 + $0x30] sm:$0xff]   ;;  %v463_v28 = vld [vmem:[#allocation4 + $0x38] sm:$0xff]  }
  0x2c   :  { %438 = vmatprep.mubr.msk.bf16.mxu0 %vm519_vm0, %v518_v0  ;;  %405 = vmatpush3.bf16.msra.mxu1 %v449_v6  ;;  %v358_v29 = vld [vmem:[%s629_s4] ss:$0 sm:$0xff]  ;;  %vm343_vm5 = vmand %vm341_vm3, %vm342_vm4 }
  0x2d   :  { %406 = vmatprep.subr.bf16.mxu1 %v518_v0  ;;  %423 = vmatpush3.bf16.msra.mxu0 %v456_v13  ;;  %v367_v37 = vld [vmem:[%s631_s6] ss:$0 sm:$0xff] }
  0x2e   :  { %424 = vmatprep.subr.bf16.mxu0 %v518_v0 }
  0x30   :  { %407 = vmatpush3.bf16.msra.mxu1 %v450_v7 }
  0x31   :  { %408 = vmatprep.subr.bf16.mxu1 %v518_v0  ;;  %425 = vmatpush3.bf16.msra.mxu0 %v457_v14 }
  0x32   :  { %426 = vmatprep.subr.bf16.mxu0 %v518_v0 }
  0x34   :  { %409 = vmatpush3.bf16.msra.mxu1 %v451_v8 }
  0x35   :  { %410 = vmatprep.subr.bf16.mxu1 %v518_v0  ;;  %427 = vmatpush3.bf16.msra.mxu0 %v458_v15 }
  0x36   :  { %428 = vmatprep.subr.bf16.mxu0 %v518_v0 }
  0x38   :  { %411 = vmatpush3.bf16.msra.mxu1 %v452_v9 }
  0x39   :  { %412 = vmatprep.subr.bf16.mxu1 %v518_v0  ;;  %429 = vmatpush3.bf16.msra.mxu0 %v459_v16 }
  0x3a   :  { %430 = vmatprep.subr.bf16.mxu0 %v518_v0 }
  0x3c   :  { %413 = vmatpush3.bf16.msra.mxu1 %v453_v10 }
  0x3d   :  { %414 = vmatprep.subr.bf16.mxu1 %v518_v0  ;;  %431 = vmatpush3.bf16.msra.mxu0 %v460_v17 }
  0x3e   :  { %432 = vmatprep.subr.bf16.mxu0 %v518_v0 }
  0x40   :  { %415 = vmatpush3.bf16.msra.mxu1 %v454_v11 }
  0x41   :  { %416 = vmatprep.subr.bf16.mxu1 %v518_v0  ;;  %433 = vmatpush3.bf16.msra.mxu0 %v461_v18 }
  0x42   :  { %434 = vmatprep.subr.bf16.mxu0 %v518_v0 }
  0x44   :  { %417 = vmatpush3.bf16.msra.mxu1 %v455_v12 }
  0x45   :  { %435 = vmatpush3.bf16.msra.mxu0 %v462_v27 }
  0x46   :  { %436 = vmatprep.subr.bf16.mxu0 %v518_v0 }
  0x49   :  { %437 = vmatpush3.bf16.msra.mxu0 %v463_v28 }
  0xfe   :  { %v107_v20 = vpop.f32.mrb[0].mxu0 }
  0xff   :  { %v108_v21 = vadd.f32 %v356_v19, %v107_v20  ;;  %v400_v22 = vpop.f32.mrb[1].mxu0 }
 0x100   :  { %v110_v23 = vpop.f32.mrb[2].mxu0 }
 0x101   :  { %v113_v24 = vmax.f32 %v108_v21, 0.0  ;;  %v401_v25 = vpop.f32.mrb[3].mxu0 }
 0x103   :  { %v114_v26 = vpack.c.bf16 %v113_v24, %v113_v24 }
 0x105   :  { %419 = vmatmul.mubr.bf16.vlgmr.msra.gmra.mrb[0].mxu1 %v114_v26 }
 0x1d8   :  { %v220_v30 = vpop.f32.mrb[0].mxu1 }
 0x1d9   :  { %v221_v31 = vadd.f32 %v358_v29, %v220_v30  ;;  %v420_v32 = vpop.f32.mrb[1].mxu1 }
 0x1da   :  { %v223_v33 = vpop.f32.mrb[2].mxu1 }
 0x1db   :  { %v226_v34 = vmax.f32 %v221_v31, 0.0  ;;  %v421_v35 = vpop.f32.mrb[3].mxu1 }
 0x1dd   :  { %v227_v36 = vpack.c.bf16 %v226_v34, %v226_v34 }
 0x1df   :  { %439 = vmatmul.mubr.bf16.vlgmr.msra.gmra.mrb[4].mxu0 %v227_v36 }
 0x2b2   :  { %v333_v38 = vpop.f32.mrb[4].mxu0 }
 0x2b3   :  { %v334_v39 = vadd.f32 %v367_v37, %v333_v38  ;;  %v440_v40 = vpop.f32.mrb[5].mxu0 }
 0x2b4   :  { %v336_v41 = vpop.f32.mrb[6].mxu0 }
 0x2b5   :  { %v344_v42 = vmax.f32 %v334_v39, -20.0  ;;  %v441_v43 = vpop.f32.mrb[7].mxu0 }
 0x2b7   :  { %v345_v44 = vmin.f32 %v344_v42, 2.0 }
 0x2b9   :  { %v346_v46 = vmul.f32 1.442695, %v345_v44 }
 0x2bb   :  { %464 = vpow2.f32 %v346_v46 }
 0x2c5   :  { %v465_v48 = vpop.eup %464 }
 0x2c6   :  { %v348_v49 = vsel %vm343_vm5, %v465_v48, %v334_v39 }
 0x2c7   :  { %349 = vst [vmem:[%s632_s7] sm:$0xff] %v348_v49 }
 0x2c8   :  { %354 = vsyncpa [#allocation3], 1 }
 0x2c9   :  { %355 = vsyncpa [#allocation5], 1 }

</bundles_post_ra>
